<compile_context>
chip_gen: v7x
topology: tpu7x:2x2x1
jax: 0.10.0
libtpu: 0.0.40
codegen_flags: <defaults>
</compile_context>

<pallas_src>
import functools

import jax
import jax.numpy as jnp
from jax import lax
from jax.experimental import pallas as pl
from jax.experimental.pallas import tpu as pltpu


P_DROP = 0.3
_LANE = 128
_IN_ROWS = 16          # x block rows: 10 features + ones row + pad
_ONES_ROW = 10         # row of the x block holding the constant 1 (layer-1 bias)
_AUG = 127             # bias lane of deep W blocks == activation row forced to 1
_MAX_TB = 1024         # max batch (lane) tile
_SINGLE_BLOCK_MAX = 512  # below this padded batch, use a single grid step

# Slab row layouts (all blocks: full 128 lanes, 16-aligned row offsets).
_M_W1, _M_WE, _MAIN_ROWS = 0, 16, 32                       # main: 10->25->2
_L_W2, _L_W3, _L_W4, _L_WE, _LSTM_ROWS = 0, 16, 144, 272, 288  # lstm: 10->100->50->25->2

_MAIN_FLOPS_PER_ROW = 2 * (10 * 25 + 25 * 2)
_LSTM_FLOPS_PER_ROW = 2 * (10 * 100 + 100 * 50 + 50 * 25 + 25 * 2)


# ---------------------------------------------------------------------------
# In-kernel helpers
# ---------------------------------------------------------------------------
def _dot(w_bf16, h_f32):
    """[R,128] bf16 @ [128,tb] (cast to bf16) -> [R,tb] f32 (MXU, f32 accum)."""
    return jnp.dot(w_bf16, h_f32.astype(jnp.bfloat16),
                   preferred_element_type=jnp.float32)


def _dot_in(w_t_bf16, x_f32):
    """Layer-1 dot with transposed weights [16,128]: contract over dim 0."""
    return lax.dot_general(w_t_bf16, x_f32.astype(jnp.bfloat16),
                           dimension_numbers=(((0,), (0,)), ((), ())),
                           preferred_element_type=jnp.float32)


def _aug_row(tb):
    """f32 [128, tb] with 1.0 on row _AUG; adds the bias '1' back after dropout."""
    rows = lax.broadcasted_iota(jnp.int32, (_LANE, tb), 0)
    return (rows == _AUG).astype(jnp.float32)


def _main_branch(x, slab, aug, masks):
    w1t = slab[_M_W1:_M_W1 + _IN_ROWS, :]       # [16, 128]  (transposed, bias row)
    we = slab[_M_WE:_M_WE + 16, :]              # [16, 128]  (bias in lane 127)
    h = jnp.maximum(_dot_in(w1t, x), 0.0)       # [128, tb]
    if masks is not None:
        h = h * masks[0]
    return jnp.maximum(_dot(we, h + aug), 0.0)  # [16, tb]  (ReLU on exit: as in PyTorch)


def _lstm_branch(x, slab, aug, masks):
    w2t = slab[_L_W2:_L_W2 + _IN_ROWS, :]       # [16, 128]
    w3 = slab[_L_W3:_L_W3 + 128, :]             # [128, 128]
    w4 = slab[_L_W4:_L_W4 + 128, :]             # [128, 128]
    we = slab[_L_WE:_L_WE + 16, :]              # [16, 128]
    h = jnp.maximum(_dot_in(w2t, x), 0.0)       # [128, tb]
    if masks is not None:
        h = h * masks[0]
    h = jnp.maximum(_dot(w3, h + aug), 0.0)     # [128, tb]
    if masks is not None:
        h = h * masks[1]
    h = jnp.maximum(_dot(w4, h + aug), 0.0)     # [128, tb]
    if masks is not None:
        h = h * masks[2]
    return _dot(we, h + aug)                    # [16, tb]  (no ReLU on lstm exit)


# ---------------------------------------------------------------------------
# Kernels
# ---------------------------------------------------------------------------
def _single_kernel(*refs, branch, n_masks, training):
    if training:
        x_ref, slab_ref, mask_ref, out_ref = refs
        masks = [mask_ref[k * _LANE:(k + 1) * _LANE, :] for k in range(n_masks)]
    else:
        x_ref, slab_ref, out_ref = refs
        masks = None
    aug = _aug_row(x_ref.shape[1])
    out_ref[...] = branch(x_ref[...], slab_ref, aug, masks)


def _fused_kernel(*refs, training):
    if training:
        x_ref, mslab_ref, lslab_ref, mask_ref, out_ref = refs
        m_masks = [mask_ref[0:_LANE, :]]
        l_masks = [mask_ref[(k + 1) * _LANE:(k + 2) * _LANE, :] for k in range(3)]
    else:
        x_ref, mslab_ref, lslab_ref, out_ref = refs
        m_masks = l_masks = None
    x = x_ref[...]
    aug = _aug_row(x_ref.shape[1])
    out_ref[0:16, :] = _main_branch(x, mslab_ref, aug, m_masks)
    out_ref[16:32, :] = _lstm_branch(x, lslab_ref, aug, l_masks)


# ---------------------------------------------------------------------------
# Tiling & pallas_call wrapper
# ---------------------------------------------------------------------------
def _tiles(b):
    """Return (batch tile, #tiles).  Lanes tile is a multiple of 128."""
    bp = ((b + _LANE - 1) // _LANE) * _LANE
    if bp <= _SINGLE_BLOCK_MAX:
        return bp, 1
    nb = max(2, pl.cdiv(bp, _MAX_TB))
    if nb % 2:
        nb += 1                      # even tile count: balances v7x's 2 TensorCores
    tb = ((pl.cdiv(b, nb) + _LANE - 1) // _LANE) * _LANE
    return tb, nb


def _run(kernel, x, slabs, out_rows, n_masks, *, training, seed, flops_per_row):
    b, feat = x.shape
    tb, nb = _tiles(b)
    b_pad = tb * nb

    # Batch-on-lanes input block: [16, B_pad]; row 10 carries the constant 1
    # that turns the layer-1 bias into an extra matmul column.
    xt = jnp.zeros((_IN_ROWS, b_pad), jnp.float32)
    xt = xt.at[:feat, :b].set(x.T)
    xt = xt.at[_ONES_ROW, :].set(1.0)

    args = [xt]
    in_specs = [pl.BlockSpec((_IN_ROWS, tb), lambda i: (0, i))]
    for s in slabs:
        args.append(s)
        in_specs.append(pl.BlockSpec(s.shape, lambda i: (0, 0)))

    mask_bytes = 0
    if training:
        # TODO(synk): PyTorch's exact dropout RNG stream cannot be reproduced;
        # we use host-side JAX RNG to build pre-scaled keep-masks (keep-prob 0.7,
        # kept values scaled by 1/0.7) that the kernel just multiplies by.
        u = jax.random.uniform(jax.random.PRNGKey(seed),
                               (n_masks * _LANE, b_pad), jnp.float32)
        mask = jnp.where(u >= P_DROP, 1.0 / (1.0 - P_DROP), 0.0).astype(jnp.float32)
        args.append(mask)
        in_specs.append(pl.BlockSpec((n_masks * _LANE, tb), lambda i: (0, i)))
        mask_bytes = int(mask.size) * 4

    slab_bytes = sum(int(s.size) * s.dtype.itemsize for s in slabs)
    cost = pl.CostEstimate(
        flops=int(flops_per_row) * int(b_pad),
        transcendentals=0,
        bytes_accessed=_IN_ROWS * b_pad * 4 + out_rows * b_pad * 4
                       + slab_bytes + mask_bytes,
    )

    out = pl.pallas_call(
        kernel,
        grid=(nb,),
        in_specs=in_specs,
        out_specs=pl.BlockSpec((out_rows, tb), lambda i: (0, i)),
        out_shape=jax.ShapeDtypeStruct((out_rows, b_pad), jnp.float32),
        compiler_params=pltpu.CompilerParams(dimension_semantics=("parallel",)),
        cost_estimate=cost,
    )(*args)
    return out


# ---------------------------------------------------------------------------
# Public forward functions
# ---------------------------------------------------------------------------
def shakespeare_policy_net(x, packed, *, lstm=False, training=False, seed=0):
    """Forward of one branch. x: [B, 10] f32 -> [B, 2] f32.
    Note: the PyTorch module calls F.dropout(p=0.3) with its default
    training=True even in eval; pass training=True here for that behaviour."""
    b = x.shape[0]
    if lstm:
        kernel = functools.partial(_single_kernel, branch=_lstm_branch,
                                   n_masks=3, training=training)
        slab, n_masks, flops = packed["lstm_slab"], 3, _LSTM_FLOPS_PER_ROW
    else:
        kernel = functools.partial(_single_kernel, branch=_main_branch,
                                   n_masks=1, training=training)
        slab, n_masks, flops = packed["main_slab"], 1, _MAIN_FLOPS_PER_ROW
    out = _run(kernel, x, [slab], out_rows=16, n_masks=n_masks,
               training=training, seed=seed, flops_per_row=flops)
    return out[0:2, :b].T          # lane-dense store in kernel; cheap slice/T here


def shakespeare_policy_net_both(x, packed, *, training=False, seed=0):
    """Both branches for the same x in ONE launch. Returns (y_main, y_lstm)."""
    b = x.shape[0]
    kernel = functools.partial(_fused_kernel, training=training)
    out = _run(kernel, x, [packed["main_slab"], packed["lstm_slab"]],
               out_rows=32, n_masks=4, training=training, seed=seed,
               flops_per_row=_MAIN_FLOPS_PER_ROW + _LSTM_FLOPS_PER_ROW)
    return out[0:2, :b].T, out[16:18, :b].T


# ---------------------------------------------------------------------------
# Parameter init / packing
# ---------------------------------------------------------------------------
def init_params(key):
    """nn.Linear-style init; PyTorch-native shapes: W [out, in], b [out]."""
    shapes = {
        "lstm_linear_2": (100, 10),
        "lstm_linear_3": (50, 100),
        "lstm_linear_4": (25, 50),
        "lstm_linear_exit": (2, 25),
        "linear_1": (25, 10),
        "linear_1_exit": (2, 25),
    }
    params = {}
    for name, (fan_out, fan_in) in shapes.items():
        key, kw, kb = jax.random.split(key, 3)
        bound = 1.0 / (fan_in ** 0.5)
        params[f"{name}_w"] = jax.random.uniform(
            kw, (fan_out, fan_in), jnp.float32, -bound, bound)
        params[f"{name}_b"] = jax.random.uniform(
            kb, (fan_out,), jnp.float32, -bound, bound)
    return params


def pack_params(params):
    """Pack each branch into one [rows, 128] bf16 slab (full-lane blocks only)."""
    def first_layer_block(w, b):                 # stored transposed [16, 128]
        blk = jnp.zeros((_IN_ROWS, _LANE), jnp.float32)
        blk = blk.at[:w.shape[1], :w.shape[0]].set(w.T)
        blk = blk.at[_ONES_ROW, :b.shape[0]].set(b)
        return blk

    def deep_block(rows, w, b):                  # stored [out, in] with bias lane
        blk = jnp.zeros((rows, _LANE), jnp.float32)
        blk = blk.at[:w.shape[0], :w.shape[1]].set(w)
        blk = blk.at[:b.shape[0], _AUG].set(b)
        return blk

    main = jnp.concatenate([
        first_layer_block(params["linear_1_w"], params["linear_1_b"]),
        deep_block(16, params["linear_1_exit_w"], params["linear_1_exit_b"]),
    ], axis=0)
    lstm = jnp.concatenate([
        first_layer_block(params["lstm_linear_2_w"], params["lstm_linear_2_b"]),
        deep_block(128, params["lstm_linear_3_w"], params["lstm_linear_3_b"]),
        deep_block(128, params["lstm_linear_4_w"], params["lstm_linear_4_b"]),
        deep_block(16, params["lstm_linear_exit_w"], params["lstm_linear_exit_b"]),
    ], axis=0)
    assert main.shape[0] == _MAIN_ROWS and lstm.shape[0] == _LSTM_ROWS
    return {"main_slab": main.astype(jnp.bfloat16),
            "lstm_slab": lstm.astype(jnp.bfloat16)}


# ---------------------------------------------------------------------------
# Pure-JAX reference (eval / no-dropout path), mirroring the kernel's bf16
# rounding of weights, biases and inter-layer activations.
# ---------------------------------------------------------------------------
def _bf16(a):
    return a.astype(jnp.bfloat16).astype(jnp.float32)


def _ref_forward(x, params, lstm):
    def lin(h, name):
        return _bf16(h) @ _bf16(params[name + "_w"]).T + _bf16(params[name + "_b"])
    if lstm:
        h = jnp.maximum(lin(x, "lstm_linear_2"), 0.0)
        h = jnp.maximum(lin(h, "lstm_linear_3"), 0.0)
        h = jnp.maximum(lin(h, "lstm_linear_4"), 0.0)
        return lin(h, "lstm_linear_exit")
    h = jnp.maximum(lin(x, "linear_1"), 0.0)
    return jnp.maximum(lin(h, "linear_1_exit"), 0.0)


# ---------------------------------------------------------------------------
# Demo / self-check
# ---------------------------------------------------------------------------
if __name__ == "__main__":
    key = jax.random.PRNGKey(0)
    k_param, k_x, k_x2 = jax.random.split(key, 3)

    params = init_params(k_param)
    packed = pack_params(params)          # pack once, reuse across calls

    B = 8
    x = jax.random.normal(k_x, (B, 10), dtype=jnp.float32)

    # Single-branch calls (deterministic path).
    y_main = shakespeare_policy_net(x, packed, lstm=False)
    y_lstm = shakespeare_policy_net(x, packed, lstm=True)
    y_main, y_lstm = jax.block_until_ready((y_main, y_lstm))
    assert y_main.shape == (B, 2) and y_lstm.shape == (B, 2)

    # Fused both-branch call: one launch, one x DMA, one merged output store.
    y_main_f, y_lstm_f = shakespeare_policy_net_both(x, packed)
    jax.block_until_ready((y_main_f, y_lstm_f))

    ref_main = _ref_forward(x, params, lstm=False)
    ref_lstm = _ref_forward(x, params, lstm=True)
    assert jnp.allclose(y_main, ref_main, atol=1e-2, rtol=1e-2), \
        float(jnp.max(jnp.abs(y_main - ref_main)))
    assert jnp.allclose(y_lstm, ref_lstm, atol=1e-2, rtol=1e-2), \
        float(jnp.max(jnp.abs(y_lstm - ref_lstm)))
    assert jnp.allclose(y_main_f, ref_main, atol=1e-2, rtol=1e-2)
    assert jnp.allclose(y_lstm_f, ref_lstm, atol=1e-2, rtol=1e-2)

    # Larger batch: two even grid tiles (v7x TC balance), padded + sliced.
    B2 = 600
    x2 = jax.random.normal(k_x2, (B2, 10), dtype=jnp.float32)
    y2 = shakespeare_policy_net(x2, packed, lstm=True)
    y2 = jax.block_until_ready(y2)
    ref2 = _ref_forward(x2, params, lstm=True)
    assert y2.shape == (B2, 2)
    assert jnp.allclose(y2, ref2, atol=1e-2, rtol=1e-2), \
        float(jnp.max(jnp.abs(y2 - ref2)))

    # Training-path smoke test (stochastic dropout via host-side masks).
    y_tr_m, y_tr_l = shakespeare_policy_net_both(x, packed, training=True, seed=123)
    jax.block_until_ready((y_tr_m, y_tr_l))
    assert y_tr_m.shape == (B, 2) and y_tr_l.shape == (B, 2)
    assert bool(jnp.all(jnp.isfinite(y_tr_m))) and bool(jnp.all(jnp.isfinite(y_tr_l)))

    print("KERNEL_OK")
</pallas_src>

<mosaic_0001>
module attributes {stable_mosaic.version = 11 : i64} {
  func.func @_single_kernel(%arg0: i32, %arg1: memref<16x128xf32, #tpu.memory_space<vmem>>, %arg2: memref<32x128xbf16, #tpu.memory_space<vmem>>, %arg3: memref<16x128xf32, #tpu.memory_space<vmem>>) attributes {dimension_semantics = [#tpu.dimension_semantics<parallel>], iteration_bounds = array<i64: 1>, scalar_prefetch = 0 : i64, scratch_operands = 0 : i64, tpu.core_type = #tpu.core_type<tc>, window_params = [{transform_indices = @transform_0, window_bounds = array<i64: 16, 128>}, {pipeline_mode = #tpu.pipeline_mode<synchronous>, transform_indices = @transform_1, window_bounds = array<i64: 32, 128>}, {transform_indices = @transform_2, window_bounds = array<i64: 16, 128>}]} {
    %0 = tpu.iota {dimensions = array<i32: 0>} : vector<128x128xi32>
    %c127_i32 = arith.constant 127 : i32
    %1 = vector.broadcast %c127_i32 : i32 to vector<128x128xi32>
    %2 = arith.cmpi eq, %0, %1 : vector<128x128xi32>
    %3 = arith.extui %2 : vector<128x128xi1> to vector<128x128xi32>
    %4 = arith.sitofp %3 : vector<128x128xi32> to vector<128x128xf32>
    %c0 = arith.constant 0 : index
    %c0_0 = arith.constant 0 : index
    %5 = vector.load %arg1[%c0, %c0_0] : memref<16x128xf32, #tpu.memory_space<vmem>>, vector<16x128xf32>
    %c0_1 = arith.constant 0 : index
    %c0_2 = arith.constant 0 : index
    %6 = vector.load %arg2[%c0_1, %c0_2] : memref<32x128xbf16, #tpu.memory_space<vmem>>, vector<16x128xbf16>
    %c16 = arith.constant 16 : index
    %c0_3 = arith.constant 0 : index
    %7 = vector.load %arg2[%c16, %c0_3] : memref<32x128xbf16, #tpu.memory_space<vmem>>, vector<16x128xbf16>
    %8 = arith.truncf %5 : vector<16x128xf32> to vector<16x128xbf16>
    %cst = arith.constant dense<0.000000e+00> : vector<128x128xf32>
    %9 = tpu.matmul %6, %8, %cst {dimension_numbers = #tpu.dot_dimension_numbers<[0], [0], [1], [1], [0, 1, 1, 1], [], []>} : vector<16x128xbf16>, vector<16x128xbf16>, vector<128x128xf32> -> vector<128x128xf32>
    %cst_4 = arith.constant 0.000000e+00 : f32
    %10 = vector.broadcast %cst_4 : f32 to vector<128x128xf32>
    %11 = arith.maximumf %9, %10 : vector<128x128xf32>
    %12 = arith.addf %11, %4 : vector<128x128xf32>
    %13 = arith.truncf %12 : vector<128x128xf32> to vector<128x128xbf16>
    %cst_5 = arith.constant dense<0.000000e+00> : vector<16x128xf32>
    %14 = tpu.matmul %7, %13, %cst_5 {dimension_numbers = #tpu.dot_dimension_numbers<[1], [0], [0], [1], [0, 0, 1, 1], [], []>} : vector<16x128xbf16>, vector<128x128xbf16>, vector<16x128xf32> -> vector<16x128xf32>
    %cst_6 = arith.constant 0.000000e+00 : f32
    %15 = vector.broadcast %cst_6 : f32 to vector<16x128xf32>
    %16 = arith.maximumf %14, %15 : vector<16x128xf32>
    %c0_7 = arith.constant 0 : index
    %c0_8 = arith.constant 0 : index
    %17 = vector.load %arg3[%c0_7, %c0_8] : memref<16x128xf32, #tpu.memory_space<vmem>>, vector<16x128xf32>
    tpu.vector_store %arg3[%c0_7, %c0_8], %16 {strides = array<i32>} : memref<16x128xf32, #tpu.memory_space<vmem>>, vector<16x128xf32>,
    return
  }
  func.func @transform_0(%arg0: i32) -> (i32, i32) {
    %c0_i32 = arith.constant 0 : i32
    %c0_i32_0 = arith.constant 0 : i32
    return %c0_i32, %arg0 : i32, i32
  }
  func.func @transform_1(%arg0: i32) -> (i32, i32) {
    %c0_i32 = arith.constant 0 : i32
    %c0_i32_0 = arith.constant 0 : i32
    %c0_i32_1 = arith.constant 0 : i32
    return %c0_i32, %c0_i32_0 : i32, i32
  }
  func.func @transform_2(%arg0: i32) -> (i32, i32) {
    %c0_i32 = arith.constant 0 : i32
    %c0_i32_0 = arith.constant 0 : i32
    return %c0_i32, %arg0 : i32, i32
  }
}

</mosaic_0001>

<bundles_post_ra>
// kernel: tpu_custom_call.1
= control target key start
LH: loop header
LB: loop body
LE: loop exit
PB: predicated region body
PF: predicated region fallthrough
CT: control target
= control target key end

     0   :  { %7 = vsyncpa [#allocation3], 0  ;;  %s591_s0 = inlined_call_operand.hbm [shape: f32[16,128], index: 0, kind: input, shape index: {}]   ;;  %s592_s1 = inlined_call_operand.hbm [shape: bf16[32,128], index: 1, kind: input, shape index: {}]   ;;  %s593_s2 = inlined_call_operand.hbm [shape: f32[16,128], index: 2, kind: output, shape index: {}]  }
   0x1   :  { %8 = vsyncpa [#allocation6], 0 }
   0x2   :  { %9 = vsyncpa [#allocation4], 0  ;;  %s517_s9 = smov [#allocation2]   ;;  %s445_s13 = scalar_lea.hbm %s591_s0, 256 }
   0x3   :  { %s15_s10 = sshll.u32 %s517_s9, 4  ;;  %p446_p0 = scmp.ne.s32.totalorder %s591_s0, %s445_s13  ;;  %s16_s10 = int_to_ptr.vmem [resolvable:$true] %s15_s10 }
   0x4   :  { %p449_p1 = scmp.lt.u32.totalorder %s445_s13, %s591_s0 }
   0x6   :  { %p451_p2 = pnand %p449_p1, %p446_p0 }
   0x8   :  { %454 = shalt.err (!%p451_p2)
}
   0x9   :  { %s455_s18 = scalar_lea.vmem %s16_s10, 256  ;;  %p460_p4 = scmp.lt.s32.totalorder %s16_s10, %s16_s10 }
   0xa   :  { %p456_p3 = scmp.ne.s32.totalorder %s16_s10, %s455_s18  ;;  %p461_p5 = scmp.lt.s32.totalorder %s455_s18, %s455_s18 }
   0xc   :  { %p462_p6 = por %p461_p5, %p460_p4 }
   0xe   :  { %p463_p7 = pnand %p462_p6, %p456_p3 }
  0x10   :  { %466 = shalt.err (!%p463_p7)
}
  0x11   :  { %s518_s19 = smov 128   ;;  %s519_s20 = smov 8  }
  0x12   :  { %21 = dma.hbm_to_vmem [thread:$0]  %s591_s0, 256, %s16_s10, [#allocation3], %s518_s19, %s518_s19, %s519_s20  }
  0x13   :  { %s520_s23 = smov [#allocation5]   ;;  %s467_s27 = scalar_lea.hbm %s592_s1, 256 }
  0x14   :  { %s27_s24 = sshll.u32 %s520_s23, 4  ;;  %p468_p8 = scmp.ne.s32.totalorder %s592_s1, %s467_s27  ;;  %s28_s24 = int_to_ptr.vmem [resolvable:$true] %s27_s24 }
  0x15   :  { %p471_p9 = scmp.lt.u32.totalorder %s467_s27, %s592_s1 }
  0x17   :  { %p473_p10 = pnand %p471_p9, %p468_p8 }
  0x19   :  { %476 = shalt.err (!%p473_p10)
}
  0x1a   :  { %s477_s4 = scalar_lea.vmem %s28_s24, 256  ;;  %p482_p12 = scmp.lt.s32.totalorder %s28_s24, %s28_s24 }
  0x1b   :  { %p478_p11 = scmp.ne.s32.totalorder %s28_s24, %s477_s4  ;;  %p483_p13 = scmp.lt.s32.totalorder %s477_s4, %s477_s4 }
  0x1d   :  { %p484_p0 = por %p483_p13, %p482_p12 }
  0x1f   :  { %p485_p1 = pnand %p484_p0, %p478_p11 }
  0x21   :  { %488 = shalt.err (!%p485_p1)
}
  0x22   :  { %s521_s0 = smov 64   ;;  %s522_s5 = smov 4  }
  0x23   :  { %33 = dma.hbm_to_vmem [thread:$0]  %s592_s1, 256, %s28_s24, [#allocation6], %s521_s0, %s521_s0, %s522_s5  }
  0x24   :  { %511 = dma.done.wait [#allocation3], 256  }
  0x25   :  { %512 = vsyncadd [#allocation3], 4294967040 }
  0x26   :  { %513 = dma.done.wait [#allocation6], 256  }
  0x27   :  { %514 = vsyncadd [#allocation6], 4294967040  ;;  %v443_v0 = vld [vmem:[#allocation5] sm:$0xff]   ;;  %v106_v1 = vld [vmem:[#allocation2] sm:$0xff]  ;;  %vm135_vm0 = vcmask 130048   ;;  %v523_v12 = vmov 0.0   ;;  %v41_v29 = vlaneseq }
  0x28   :  { %v107_v2 = vld [vmem:[#allocation2 + $0x8] sm:$0xff]  ;;  %119 = vxpose.xlu0.c.b16.start.end [1/1] (short) %v443_v0, 128  ;;  %413 = vmatprep.subr.bf16.mxu1 %v523_v12  ;;  %vm524_vm1 = vmmov 0   ;;  %v444_v58 = vld [vmem:[#allocation5 + $0x8] sm:$0xff]   ;;  %s525_s1 = smov [#allocation7]  }
  0x29   :  { %v112_v3 = vpack.c.bf16 %v107_v2, %v106_v1  ;;  %429 = vmatprep.mubr.msk.bf16.mxu1 %vm524_vm1, %v523_v12  ;;  %v42_v34 = vshrl.u32 %v41_v29, 7  ;;  %s353_s8 = sshll.u32 %s525_s1, 4  ;;  %s354_s8 = int_to_ptr.vmem [resolvable:$true] %s353_s8 }
  0x2a   :  { %s489_s9 = scalar_lea.vmem %s354_s8, 256  ;;  %p494_p3 = scmp.lt.s32.totalorder %s354_s8, %s354_s8 }
  0x2b   :  { %395 = vmatprep.subr.bf16.mxu0 %v112_v3  ;;  %v57_v41 = vadd.s32 120, %v42_v34  ;;  %p490_p2 = scmp.ne.s32.totalorder %s354_s8, %s489_s9  ;;  %p495_p4 = scmp.lt.s32.totalorder %s489_s9, %s489_s9 }
  0x2c   :  { %396 = vmatpush3.bf16.msra.mxu0 %v112_v3 }
  0x2d   :  { %vm73_vm2 = vcmp.eq.s32.totalorder %v57_v41, 127  ;;  %p496_p5 = por %p495_p4, %p494_p3 }
  0x2e   :  { %v366_v48 = vsel %vm73_vm2, 1.0, %v523_v12 }
  0x2f   :  { %p497_p6 = pnand %p496_p5, %p490_p2 }
  0x8e   :  { %v127_v4 = vpop.trf.xlu0 }
  0x8f   :  { %397 = vmatprep.mubr.msk.bf16.mxu0 %vm135_vm0, %v127_v4 }
  0x92   :  { %v128_v5 = vpop.trf.xlu0 }
  0x93   :  { %398 = vmatmul.mubr.msk.bf16.vlgmr.msra.gmra.mrb[0].mxu0 %vm135_vm0, %v128_v5 }
  0x96   :  { %v129_v6 = vpop.trf.xlu0 }
  0x97   :  { %401 = vmatprep.mubr.msk.bf16.mxu0 %vm135_vm0, %v129_v6 }
  0x9a   :  { %v130_v7 = vpop.trf.xlu0 }
  0x9b   :  { %402 = vmatmul.mubr.msk.bf16.gmra.mrb[4].mxu0 %vm135_vm0, %v130_v7 }
  0x9e   :  { %v131_v8 = vpop.trf.xlu0 }
  0x9f   :  { %405 = vmatprep.mubr.msk.bf16.mxu0 %vm135_vm0, %v131_v8 }
  0xa2   :  { %v132_v9 = vpop.trf.xlu0 }
  0xa3   :  { %406 = vmatmul.mubr.msk.bf16.gmra.mrb[8].mxu0 %vm135_vm0, %v132_v9 }
  0xa6   :  { %v133_v10 = vpop.trf.xlu0 }
  0xa7   :  { %409 = vmatprep.mubr.msk.bf16.mxu0 %vm135_vm0, %v133_v10 }
  0xaa   :  { %v134_v11 = vpop.trf.xlu0 }
  0xab   :  { %410 = vmatmul.mubr.msk.bf16.gmra.mrb[12].mxu0 %vm135_vm0, %v134_v11 }
 0x166   :  { %v399_v13 = vpop.f32.mrb[0].mxu0 }
 0x167   :  { %v194_v14 = vpop.f32.mrb[1].mxu0  ;;  %v259_v16 = vmax.f32 %v399_v13, 0.0 }
 0x168   :  { %v400_v15 = vpop.f32.mrb[2].mxu0  ;;  %v257_v19 = vmax.f32 %v194_v14, 0.0 }
 0x169   :  { %v260_v17 = vmax.f32 %v400_v15, 0.0  ;;  %v197_v18 = vpop.f32.mrb[3].mxu0 }
 0x16a   :  { %v258_v20 = vmax.f32 %v197_v18, 0.0 }
 0x16b   :  { %v290_v21 = vpack.c.bf16 %v260_v17, %v259_v16 }
 0x16c   :  { %v289_v22 = vpack.c.bf16 %v258_v20, %v257_v19 }
 0x16e   :  { %v403_v23 = vpop.f32.mrb[4].mxu0  ;;  %414 = vmatpush3.bf16.msra.mxu1 %v289_v22 }
 0x16f   :  { %v210_v24 = vpop.f32.mrb[5].mxu0  ;;  %415 = vmatprep.subr.bf16.mxu1 %v523_v12  ;;  %v263_v26 = vmax.f32 %v403_v23, 0.0 }
 0x170   :  { %v404_v25 = vpop.f32.mrb[6].mxu0  ;;  %v261_v30 = vmax.f32 %v210_v24, 0.0 }
 0x171   :  { %v264_v27 = vmax.f32 %v404_v25, 0.0  ;;  %v213_v28 = vpop.f32.mrb[7].mxu0 }
 0x172   :  { %v262_v31 = vmax.f32 %v213_v28, 0.0  ;;  %416 = vmatpush3.bf16.msra.mxu1 %v290_v21 }
 0x173   :  { %v292_v32 = vpack.c.bf16 %v264_v27, %v263_v26  ;;  %417 = vmatprep.subr.bf16.mxu1 %v523_v12 }
 0x174   :  { %v291_v33 = vpack.c.bf16 %v262_v31, %v261_v30 }
 0x176   :  { %v407_v35 = vpop.f32.mrb[8].mxu0  ;;  %418 = vmatpush3.bf16.msra.mxu1 %v291_v33 }
 0x177   :  { %v226_v36 = vpop.f32.mrb[9].mxu0  ;;  %419 = vmatprep.subr.bf16.mxu1 %v523_v12  ;;  %v267_v38 = vmax.f32 %v407_v35, 0.0 }
 0x178   :  { %v408_v37 = vpop.f32.mrb[10].mxu0  ;;  %v265_v42 = vmax.f32 %v226_v36, 0.0 }
 0x179   :  { %v268_v39 = vmax.f32 %v408_v37, 0.0  ;;  %v229_v40 = vpop.f32.mrb[11].mxu0 }
 0x17a   :  { %v266_v43 = vmax.f32 %v229_v40, 0.0  ;;  %420 = vmatpush3.bf16.msra.mxu1 %v292_v32 }
 0x17b   :  { %v294_v44 = vpack.c.bf16 %v268_v39, %v267_v38  ;;  %421 = vmatprep.subr.bf16.mxu1 %v523_v12 }
 0x17c   :  { %v293_v45 = vpack.c.bf16 %v266_v43, %v265_v42 }
 0x17e   :  { %v411_v46 = vpop.f32.mrb[12].mxu0  ;;  %422 = vmatpush3.bf16.msra.mxu1 %v293_v45 }
 0x17f   :  { %v242_v47 = vpop.f32.mrb[13].mxu0  ;;  %423 = vmatprep.subr.bf16.mxu1 %v523_v12  ;;  %v271_v54 = vmax.f32 %v411_v46, 0.0 }
 0x180   :  { %v412_v49 = vpop.f32.mrb[14].mxu0  ;;  %v269_v52 = vmax.f32 %v242_v47, 0.0 }
 0x181   :  { %v272_v50 = vmax.f32 %v412_v49, 0.0  ;;  %v245_v51 = vpop.f32.mrb[15].mxu0 }
 0x182   :  { %v270_v53 = vmax.f32 %v245_v51, 0.0  ;;  %424 = vmatpush3.bf16.msra.mxu1 %v294_v44 }
 0x183   :  { %v288_v55 = vadd.f32 %v366_v48, %v272_v50  ;;  %425 = vmatprep.subr.bf16.mxu1 %v523_v12 }
 0x184   :  { %v295_v56 = vpack.c.bf16 %v270_v53, %v269_v52 }
 0x185   :  { %v296_v57 = vpack.c.bf16 %v288_v55, %v271_v54 }
 0x186   :  { %426 = vmatpush3.bf16.msra.mxu1 %v295_v56 }
 0x187   :  { %427 = vmatprep.subr.bf16.mxu1 %v523_v12 }
 0x18a   :  { %428 = vmatpush3.bf16.msra.mxu1 %v296_v57 }
 0x18d   :  { %430 = vmatmul.mubr.bf16.vlgmr.msra.gmra.mrb[0].mxu1 %v444_v58 }
 0x260   :  { %v337_v59 = vpop.f32.mrb[0].mxu1 }
 0x261   :  { %v344_v60 = vmax.f32 %v337_v59, 0.0  ;;  %v431_v61 = vpop.f32.mrb[1].mxu1 }
 0x262   :  { %v340_v62 = vpop.f32.mrb[2].mxu1 }
 0x263   :  { %346 = vst [vmem:[#allocation7] sm:$0xff] %v344_v60  ;;  %v345_v63 = vmax.f32 %v340_v62, 0.0  ;;  %v432_v0 = vpop.f32.mrb[3].mxu1 }
 0x265   :  { %347 = vst [vmem:[#allocation7 + $0x8] sm:$0xff] %v345_v63 }
 0x266   :  { %500 = shalt.err (!%p497_p6)
}
 0x267   :  { %s501_s12 = scalar_lea.hbm %s593_s2, 256 }
 0x268   :  { %p502_p7 = scmp.ne.s32.totalorder %s593_s2, %s501_s12  ;;  %p505_p8 = scmp.lt.u32.totalorder %s501_s12, %s593_s2 }
 0x26a   :  { %p507_p9 = pnand %p505_p8, %p502_p7 }
 0x26c   :  { %510 = shalt.err (!%p507_p9)
}
 0x26d   :  { %359 = dma.vmem_to_hbm [thread:$0]  %s354_s8, 256, %s593_s2, [#allocation4], %s518_s19, %s518_s19, %s519_s20  }
 0x26e   :  { %515 = dma.done.wait [#allocation4], 256  }
 0x26f   :  { %516 = vsyncadd [#allocation4], 4294967040 }
 0x270   :  { %363 = vsyncpa [#allocation3], 1 }
 0x271   :  { %364 = vsyncpa [#allocation6], 1 }
 0x272   :  { %365 = vsyncpa [#allocation4], 1 }

</bundles_post_ra>
